<compile_context>
chip_gen: v7x
topology: tpu7x:2x2x1
jax: 0.10.0
libtpu: 0.0.40
codegen_flags: <defaults>
</compile_context>

<pallas_src>
import functools

import jax
import jax.numpy as jnp
from jax.experimental import pallas as pl
from jax.experimental.pallas import tpu as pltpu


# ----------------------------- kernel body ---------------------------------


def residual_block_kernel(x_ref, w1_ref, b1_ref, w2_ref, b2_ref, o_ref):
    """Fused Linear -> ReLU -> Linear applied sequentially (module's forward)."""
    x = x_ref[...].astype(w1_ref.dtype)                        # in-kernel f32 -> bf16 cast
    # nn.Linear #1:  h = x @ W1^T + b1   (W1 pre-transposed/padded outside)
    h = jnp.dot(x, w1_ref[...], preferred_element_type=jnp.float32)
    h = h + b1_ref[...]                                        # f32 bias (1, HID_P)
    # nn.ReLU()
    h = jnp.maximum(h, 0.0)
    # nn.Linear #2:  y = h @ W2^T + b2
    y = jnp.dot(h.astype(w2_ref.dtype), w2_ref[...],
                preferred_element_type=jnp.float32)
    y = y + b2_ref[...]                                        # f32 bias (1, OUT_P)
    o_ref[...] = y.astype(o_ref.dtype)


# ----------------------------- host-side glue -------------------------------


def _round_up(n, m):
    return ((n + m - 1) // m) * m


def prepare_residual_block_params(w1, b1, w2, b2, *, compute_dtype=jnp.bfloat16):
    """One-time weight prep (hoist out of the attacker loop).

    w1: (HID, IN)  b1: (HID,)   -- PyTorch nn.Linear layout (out, in)
    w2: (OUT, HID) b2: (OUT,)

    Returns lane-dense, pre-transposed, bf16 weights and f32 biases plus the
    original feature dims.  W1^T keeps the true IN rows (x is NOT padded);
    HID / OUT are zero-padded to multiples of 128, which is exact through
    matmul + bias + ReLU.
    """
    HID, IN = w1.shape
    OUT = w2.shape[0]
    HID_P = _round_up(HID, 128)
    OUT_P = _round_up(OUT, 128)

    w1t = jnp.zeros((IN, HID_P), compute_dtype).at[:, :HID].set(
        jnp.transpose(w1).astype(compute_dtype))
    w2t = jnp.zeros((HID_P, OUT_P), compute_dtype).at[:HID, :OUT].set(
        jnp.transpose(w2).astype(compute_dtype))
    # Biases stay f32 (added after the f32-accumulating matmul).
    b1r = jnp.zeros((1, HID_P), jnp.float32).at[0, :HID].set(b1.astype(jnp.float32))
    b2r = jnp.zeros((1, OUT_P), jnp.float32).at[0, :OUT].set(b2.astype(jnp.float32))

    dims = dict(IN=IN, HID=HID, OUT=OUT, HID_P=HID_P, OUT_P=OUT_P)
    return (w1t, b1r, w2t, b2r), dims


@functools.partial(jax.jit, static_argnames=("tile_b", "out_features", "out_dtype"))
def _forward_impl(x, w1t, b1r, w2t, b2r, *, tile_b, out_features, out_dtype):
    B, IN = x.shape
    if w1t.shape[0] != IN:
        raise ValueError(f"w1t expects IN={w1t.shape[0]}, got x with IN={IN}")
    HID_P = w1t.shape[1]
    OUT_P = w2t.shape[1]

    grid = (pl.cdiv(B, tile_b),)

    # Invariant operands never change across grid steps -> single buffer.
    invariant = pl.Buffered(buffer_count=1)

    # VMEM budget: double-buffered x/out tiles + single-buffered weights/biases.
    vmem_bytes = (
        2 * tile_b * IN * 4            # x tile, f32 (cast in-kernel), double-buffered
        + 2 * tile_b * OUT_P * 2       # out tile, bf16, double-buffered
        + IN * HID_P * 2               # W1^T, bf16, single-buffered
        + HID_P * OUT_P * 2            # W2^T, bf16, single-buffered
        + 8 * (HID_P + OUT_P) * 4      # biases, f32, 8-sublane padding
    )
    try:
        vmem_cap = int(0.9 * pltpu.get_tpu_info().vmem_capacity_bytes)
    except Exception:
        vmem_cap = int(0.9 * (64 << 20))   # conservative: v7x has 64 MiB / TC
    vmem_limit = int(min(max(vmem_bytes + (4 << 20), 16 << 20), vmem_cap))

    out_p = pl.pallas_call(
        residual_block_kernel,
        out_shape=jax.ShapeDtypeStruct((B, OUT_P), out_dtype),
        grid_spec=pltpu.PrefetchScalarGridSpec(
            num_scalar_prefetch=0,
            grid=grid,
            in_specs=[
                # x streams: last dim = full IN (full-dim block, no padding pass).
                pl.BlockSpec((tile_b, IN), lambda i: (i, 0)),
                pl.BlockSpec((IN, HID_P), lambda i: (0, 0), pipeline_mode=invariant),
                pl.BlockSpec((1, HID_P), lambda i: (0, 0), pipeline_mode=invariant),
                pl.BlockSpec((HID_P, OUT_P), lambda i: (0, 0), pipeline_mode=invariant),
                pl.BlockSpec((1, OUT_P), lambda i: (0, 0), pipeline_mode=invariant),
            ],
            out_specs=pl.BlockSpec((tile_b, OUT_P), lambda i: (i, 0)),
        ),
        compiler_params=pltpu.CompilerParams(
            dimension_semantics=("parallel",),     # batch tiles shard across TCs (v7x)
            vmem_limit_bytes=vmem_limit,
        ),
    )(x, w1t, b1r, w2t, b2r)

    # Rows never need slicing (out_shape already has B rows; out-of-bounds rows
    # of the last tile are discarded).  Only drop padded OUT columns if any.
    if OUT_P != out_features:
        out_p = out_p[:, :out_features]
    return out_p


def _default_tile_b(B):
    if B < 16:
        return B                                   # one full-dim tile, no remainder
    if B <= 2048:
        # >= 2 tiles so ("parallel",) actually uses both v7x TensorCores;
        # 16/128-row alignment keeps bf16 output tiles and the MXU happy.
        half = pl.cdiv(B, 2)
        return _round_up(half, 128) if B >= 256 else _round_up(half, 16)
    return 1024                                    # mem-bound sweet spot (v5e/v6e)


def residual_block_forward(x, params, dims, *, tile_b=None, out_dtype=jnp.bfloat16):
    """Apply ResidualBlock = [Linear, ReLU, Linear] to x of shape (B, IN)."""
    B = x.shape[0]
    if tile_b is None:
        tile_b = _default_tile_b(B)
    w1t, b1r, w2t, b2r = params
    return _forward_impl(x, w1t, b1r, w2t, b2r,
                         tile_b=tile_b, out_features=dims["OUT"],
                         out_dtype=out_dtype)


# TODO(synk): for layers too large to keep both weights resident on v7x
# ((IN*HID_P + HID_P*OUT_P)*2 bytes > ~24-28 MiB), add a K-tiled reduction grid
# axis over IN chunks with an f32 VMEM accumulator (init at k==0, ReLU + second
# matmul + bias at k==last) instead of the resident-weight strategy used here.


# ----------------------------- reference & test -----------------------------


def _reference_f32(x, w1, b1, w2, b2):
    h = jnp.maximum(x @ w1.T + b1, 0.0)
    return h @ w2.T + b2


def _reference_matched(x, w1, b1, w2, b2):
    """Mirrors the kernel's precision recipe exactly (bf16 ops, f32 accum)."""
    xb = x.astype(jnp.bfloat16).astype(jnp.float32)
    w1b = w1.astype(jnp.bfloat16).astype(jnp.float32)
    w2b = w2.astype(jnp.bfloat16).astype(jnp.float32)
    h = xb @ w1b.T + b1
    h = jnp.maximum(h, 0.0)
    h = h.astype(jnp.bfloat16).astype(jnp.float32)      # kernel feeds bf16 h to MXU #2
    y = h @ w2b.T + b2
    return y.astype(jnp.bfloat16).astype(jnp.float32)   # kernel stores bf16 output


if __name__ == "__main__":
    B, IN, HID, OUT = 8, 32, 64, 32

    key = jax.random.PRNGKey(0)
    kx, kw1, kb1, kw2, kb2 = jax.random.split(key, 5)

    x = jax.random.normal(kx, (B, IN), dtype=jnp.float32)
    # PyTorch-shaped parameters (nn.Linear: weight (out, in), bias (out,)).
    w1 = jax.random.normal(kw1, (HID, IN), dtype=jnp.float32) * 0.1
    b1 = jax.random.normal(kb1, (HID,), dtype=jnp.float32) * 0.1
    w2 = jax.random.normal(kw2, (OUT, HID), dtype=jnp.float32) * 0.1
    b2 = jax.random.normal(kb2, (OUT,), dtype=jnp.float32) * 0.1

    # One-time parameter prep (hoisted out of the attacker loop).
    params, dims = prepare_residual_block_params(w1, b1, w2, b2)

    out = residual_block_forward(x, params, dims)
    out = jax.block_until_ready(out)
    assert out.shape == (B, OUT)
    out_f32 = jnp.asarray(out, dtype=jnp.float32)

    # Check against a reference computed with the kernel's exact precision
    # recipe (bf16 operands / hidden / output, f32 accumulation + bias).
    ref_m = _reference_matched(x, w1, b1, w2, b2)
    assert jnp.allclose(out_f32, ref_m, atol=2e-2, rtol=2e-2), \
        "mismatch vs precision-matched reference"

    # Loose sanity check against the full-f32 reference (bf16-level tolerance).
    ref_f = _reference_f32(x, w1, b1, w2, b2)
    max_err = float(jnp.max(jnp.abs(out_f32 - ref_f)))
    assert max_err < 0.1, f"mismatch vs f32 reference (max abs err {max_err})"

    print("KERNEL_OK")
</pallas_src>

<mosaic_0001>
module attributes {stable_mosaic.version = 11 : i64} {
  func.func @residual_block_kernel(%arg0: i32, %arg1: memref<8x32xf32, #tpu.memory_space<vmem>>, %arg2: memref<32x128xbf16, #tpu.memory_space<vmem>>, %arg3: memref<1x128xf32, #tpu.memory_space<vmem>>, %arg4: memref<128x128xbf16, #tpu.memory_space<vmem>>, %arg5: memref<1x128xf32, #tpu.memory_space<vmem>>, %arg6: memref<8x128xbf16, #tpu.memory_space<vmem>>) attributes {dimension_semantics = [#tpu.dimension_semantics<parallel>], iteration_bounds = array<i64: 1>, scalar_prefetch = 0 : i64, scratch_operands = 0 : i64, tpu.core_type = #tpu.core_type<tc>, window_params = [{transform_indices = @transform_0, window_bounds = array<i64: 8, 32>}, {pipeline_mode = #tpu.pipeline_mode<synchronous>, transform_indices = @transform_1, window_bounds = array<i64: 32, 128>}, {pipeline_mode = #tpu.pipeline_mode<synchronous>, transform_indices = @transform_2, window_bounds = array<i64: 1, 128>}, {pipeline_mode = #tpu.pipeline_mode<synchronous>, transform_indices = @transform_3, window_bounds = array<i64: 128, 128>}, {pipeline_mode = #tpu.pipeline_mode<synchronous>, transform_indices = @transform_4, window_bounds = array<i64: 1, 128>}, {transform_indices = @transform_5, window_bounds = array<i64: 8, 128>}]} {
    %c0 = arith.constant 0 : index
    %c0_0 = arith.constant 0 : index
    %0 = vector.load %arg1[%c0, %c0_0] : memref<8x32xf32, #tpu.memory_space<vmem>>, vector<8x32xf32>
    %1 = arith.truncf %0 : vector<8x32xf32> to vector<8x32xbf16>
    %c0_1 = arith.constant 0 : index
    %c0_2 = arith.constant 0 : index
    %2 = vector.load %arg2[%c0_1, %c0_2] : memref<32x128xbf16, #tpu.memory_space<vmem>>, vector<32x128xbf16>
    %cst = arith.constant dense<0.000000e+00> : vector<8x128xf32>
    %3 = tpu.matmul %1, %2, %cst {dimension_numbers = #tpu.dot_dimension_numbers<[1], [0], [0], [1], [0, 0, 1, 1], [], []>} : vector<8x32xbf16>, vector<32x128xbf16>, vector<8x128xf32> -> vector<8x128xf32>
    %c0_3 = arith.constant 0 : index
    %c0_4 = arith.constant 0 : index
    %4 = vector.load %arg3[%c0_3, %c0_4] : memref<1x128xf32, #tpu.memory_space<vmem>>, vector<1x128xf32>
    %5 = vector.broadcast %4 : vector<1x128xf32> to vector<8x128xf32>
    %6 = arith.addf %3, %5 : vector<8x128xf32>
    %cst_5 = arith.constant 0.000000e+00 : f32
    %7 = vector.broadcast %cst_5 : f32 to vector<8x128xf32>
    %8 = arith.maximumf %6, %7 : vector<8x128xf32>
    %9 = arith.truncf %8 : vector<8x128xf32> to vector<8x128xbf16>
    %c0_6 = arith.constant 0 : index
    %c0_7 = arith.constant 0 : index
    %10 = vector.load %arg4[%c0_6, %c0_7] : memref<128x128xbf16, #tpu.memory_space<vmem>>, vector<128x128xbf16>
    %cst_8 = arith.constant dense<0.000000e+00> : vector<8x128xf32>
    %11 = tpu.matmul %9, %10, %cst_8 {dimension_numbers = #tpu.dot_dimension_numbers<[1], [0], [0], [1], [0, 0, 1, 1], [], []>} : vector<8x128xbf16>, vector<128x128xbf16>, vector<8x128xf32> -> vector<8x128xf32>
    %c0_9 = arith.constant 0 : index
    %c0_10 = arith.constant 0 : index
    %12 = vector.load %arg5[%c0_9, %c0_10] : memref<1x128xf32, #tpu.memory_space<vmem>>, vector<1x128xf32>
    %13 = vector.broadcast %12 : vector<1x128xf32> to vector<8x128xf32>
    %14 = arith.addf %11, %13 : vector<8x128xf32>
    %15 = arith.truncf %14 : vector<8x128xf32> to vector<8x128xbf16>
    %c0_11 = arith.constant 0 : index
    %c0_12 = arith.constant 0 : index
    %16 = vector.load %arg6[%c0_11, %c0_12] : memref<8x128xbf16, #tpu.memory_space<vmem>>, vector<8x128xbf16>
    tpu.vector_store %arg6[%c0_11, %c0_12], %15 {strides = array<i32>} : memref<8x128xbf16, #tpu.memory_space<vmem>>, vector<8x128xbf16>,
    return
  }
  func.func @transform_0(%arg0: i32) -> (i32, i32) {
    %c0_i32 = arith.constant 0 : i32
    %c0_i32_0 = arith.constant 0 : i32
    return %arg0, %c0_i32 : i32, i32
  }
  func.func @transform_1(%arg0: i32) -> (i32, i32) {
    %c0_i32 = arith.constant 0 : i32
    %c0_i32_0 = arith.constant 0 : i32
    %c0_i32_1 = arith.constant 0 : i32
    return %c0_i32, %c0_i32_0 : i32, i32
  }
  func.func @transform_2(%arg0: i32) -> (i32, i32) {
    %c0_i32 = arith.constant 0 : i32
    %c0_i32_0 = arith.constant 0 : i32
    %c0_i32_1 = arith.constant 0 : i32
    return %c0_i32, %c0_i32_0 : i32, i32
  }
  func.func @transform_3(%arg0: i32) -> (i32, i32) {
    %c0_i32 = arith.constant 0 : i32
    %c0_i32_0 = arith.constant 0 : i32
    %c0_i32_1 = arith.constant 0 : i32
    return %c0_i32, %c0_i32_0 : i32, i32
  }
  func.func @transform_4(%arg0: i32) -> (i32, i32) {
    %c0_i32 = arith.constant 0 : i32
    %c0_i32_0 = arith.constant 0 : i32
    %c0_i32_1 = arith.constant 0 : i32
    return %c0_i32, %c0_i32_0 : i32, i32
  }
  func.func @transform_5(%arg0: i32) -> (i32, i32) {
    %c0_i32 = arith.constant 0 : i32
    %c0_i32_0 = arith.constant 0 : i32
    return %arg0, %c0_i32 : i32, i32
  }
}

</mosaic_0001>

<bundles_post_ra>
// kernel: _forward_impl.1
= control target key start
LH: loop header
LB: loop body
LE: loop exit
PB: predicated region body
PF: predicated region fallthrough
CT: control target
= control target key end

     0   :  { %10 = vsyncpa [#allocation3], 0  ;;  %s524_s0 = inlined_call_operand.hbm [shape: f32[8,32], index: 0, kind: input, shape index: {}]   ;;  %s525_s1 = inlined_call_operand.hbm [shape: bf16[32,128], index: 1, kind: input, shape index: {}]   ;;  %s526_s2 = inlined_call_operand.vmem [shape: f32[1,128], index: 2, kind: input, shape index: {}]   ;;  %s527_s3 = inlined_call_operand.hbm [shape: bf16[128,128], index: 3, kind: input, shape index: {}]   ;;  %s528_s4 = inlined_call_operand.vmem [shape: f32[1,128], index: 4, kind: input, shape index: {}]   ;;  %s529_s5 = inlined_call_operand.hbm [shape: bf16[8,128], index: 5, kind: output, shape index: {}]  }
   0x1   :  { %11 = vsyncpa [#allocation6], 0 }
   0x2   :  { %12 = vsyncpa [#allocation4], 0  ;;  %s426_s18 = smov [#allocation5]   ;;  %s332_s22 = scalar_lea.hbm %s525_s1, 256 }
   0x3   :  { %s28_s19 = sshll.u32 %s426_s18, 4  ;;  %p333_p0 = scmp.ne.s32.totalorder %s525_s1, %s332_s22  ;;  %s29_s19 = int_to_ptr.vmem [resolvable:$true] %s28_s19 }
   0x4   :  { %p336_p1 = scmp.lt.u32.totalorder %s332_s22, %s525_s1 }
   0x6   :  { %p338_p2 = pnand %p336_p1, %p333_p0 }
   0x8   :  { %341 = shalt.err (!%p338_p2)
}
   0x9   :  { %s342_s27 = scalar_lea.vmem %s29_s19, 256  ;;  %p347_p4 = scmp.lt.s32.totalorder %s29_s19, %s29_s19 }
   0xa   :  { %p343_p3 = scmp.ne.s32.totalorder %s29_s19, %s342_s27  ;;  %p348_p5 = scmp.lt.s32.totalorder %s342_s27, %s342_s27 }
   0xc   :  { %p349_p6 = por %p348_p5, %p347_p4 }
   0xe   :  { %p350_p7 = pnand %p349_p6, %p343_p3 }
  0x10   :  { %353 = shalt.err (!%p350_p7)
}
  0x11   :  { %s427_s28 = smov 64   ;;  %s428_s29 = smov 4  }
  0x12   :  { %34 = dma.hbm_to_vmem [thread:$0]  %s525_s1, 256, %s29_s19, [#allocation6], %s427_s28, %s427_s28, %s428_s29  }
  0x13   :  { %s429_s7 = smov [#allocation2]   ;;  %s430_s9 = smov [#allocation7]  }
  0x14   :  { %s19_s8 = sshll.u32 %s429_s7, 4  ;;  %s42_s10 = sshll.u32 %s430_s9, 4  ;;  %s20_s8 = int_to_ptr.vmem [resolvable:$true] %s19_s8  ;;  %s43_s10 = int_to_ptr.vmem [resolvable:$true] %s42_s10 }
  0x15   :  { %s354_s13 = scalar_lea.hbm %s524_s0, 128 }
  0x16   :  { %p355_p8 = scmp.ne.s32.totalorder %s524_s0, %s354_s13  ;;  %p358_p9 = scmp.lt.u32.totalorder %s354_s13, %s524_s0 }
  0x18   :  { %p360_p10 = pnand %p358_p9, %p355_p8 }
  0x1a   :  { %363 = shalt.err (!%p360_p10)
}
  0x1b   :  { %s364_s1 = scalar_lea.vmem %s20_s8, 128  ;;  %p369_p12 = scmp.lt.s32.totalorder %s20_s8, %s20_s8 }
  0x1c   :  { %p365_p11 = scmp.ne.s32.totalorder %s20_s8, %s364_s1  ;;  %p370_p13 = scmp.lt.s32.totalorder %s364_s1, %s364_s1 }
  0x1e   :  { %p371_p0 = por %p370_p13, %p369_p12 }
  0x20   :  { %p372_p1 = pnand %p371_p0, %p365_p11 }
  0x22   :  { %375 = shalt.err (!%p372_p1)
}
  0x23   :  { %22 = dma.hbm_to_vmem [thread:$0]  %s524_s0, 128, %s20_s8, [#allocation3]  }
  0x24   :  { %s376_s22 = scalar_lea.hbm %s527_s3, 1024 }
  0x25   :  { %p377_p2 = scmp.ne.s32.totalorder %s527_s3, %s376_s22  ;;  %p380_p3 = scmp.lt.u32.totalorder %s376_s22, %s527_s3 }
  0x27   :  { %p382_p4 = pnand %p380_p3, %p377_p2 }
  0x29   :  { %385 = shalt.err (!%p382_p4)
}
  0x2a   :  { %s386_s27 = scalar_lea.vmem %s43_s10, 1024  ;;  %p391_p6 = scmp.lt.s32.totalorder %s43_s10, %s43_s10 }
  0x2b   :  { %p387_p5 = scmp.ne.s32.totalorder %s43_s10, %s386_s27  ;;  %p392_p7 = scmp.lt.s32.totalorder %s386_s27, %s386_s27 }
  0x2d   :  { %p393_p8 = por %p392_p7, %p391_p6 }
  0x2f   :  { %p394_p9 = pnand %p393_p8, %p387_p5 }
  0x31   :  { %397 = shalt.err (!%p394_p9)
}
  0x32   :  { %48 = dma.hbm_to_vmem [thread:$0]  %s527_s3, 1024, %s43_s10, [#allocation6], %s427_s28, %s427_s28, %s428_s29  }
  0x33   :  { %420 = dma.done.wait [#allocation3], 128  }
  0x34   :  { %421 = vsyncadd [#allocation3], 4294967168 }
  0x35   :  { %422 = dma.done.wait [#allocation6], 1280  }
  0x36   :  { %423 = vsyncadd [#allocation6], 4294966016  ;;  %v431_v0 = vmov 0.0   ;;  %vm432_vm0 = vmmov 0   ;;  %v322_v1 = vld [vmem:[#allocation5] sm:$0xff]   ;;  %v323_v2 = vld [vmem:[#allocation5 + $0x8] sm:$0xff]  }
  0x37   :  { %286 = vmatprep.subr.bf16.mxu0 %v431_v0  ;;  %290 = vmatprep.mubr.msk.bf16.mxu0 %vm432_vm0, %v431_v0  ;;  %v61_v3 = vld [vmem:[#allocation2] sm:$0xff]  ;;  %v324_v4 = vld [vmem:[#allocation7] sm:$0xff]   ;;  %vm86_vm1 = vcmask 261120   ;;  %v326_v7 = vld [vmem:[#allocation7 + $0x10] sm:$0xff]   ;;  %s433_s7 = smov [#allocation8]  }
  0x38   :  { %294 = vmatprep.subr.bf16.mxu1 %v431_v0  ;;  %310 = vmatprep.mubr.msk.bf16.mxu1 %vm432_vm0, %v431_v0  ;;  %v62_v5 = vpack.c.bf16 %v61_v3, %v61_v3  ;;  %v325_v6 = vld [vmem:[#allocation7 + $0x8] sm:$0xff]   ;;  %v327_v8 = vld [vmem:[#allocation7 + $0x18] sm:$0xff]   ;;  %v328_v9 = vld [vmem:[#allocation7 + $0x20] sm:$0xff]   ;;  %s251_s8 = sshll.u32 %s433_s7, 4  ;;  %s252_s8 = int_to_ptr.vmem [resolvable:$true] %s251_s8 }
  0x39   :  { %287 = vmatpush3.bf16.msra.mxu0 %v322_v1  ;;  %295 = vmatpush3.bf16.msra.mxu1 %v324_v4  ;;  %v329_v10 = vld [vmem:[#allocation7 + $0x28] sm:$0xff]   ;;  %v330_v11 = vld [vmem:[#allocation7 + $0x30] sm:$0xff]   ;;  %v331_v12 = vld [vmem:[#allocation7 + $0x38] sm:$0xff]   ;;  %p403_p11 = scmp.lt.s32.totalorder %s252_s8, %s252_s8 }
  0x3a   :  { %288 = vmatprep.subr.bf16.mxu0 %v431_v0  ;;  %296 = vmatprep.subr.bf16.mxu1 %v431_v0  ;;  %v261_v13 = vld [vmem:[%s526_s2] ss:$0 sm:$0xff]  ;;  %s398_s2 = scalar_lea.vmem %s252_s8, 64 }
  0x3b   :  { %v265_v21 = vld [vmem:[%s528_s4] ss:$0 sm:$0xff]  ;;  %p399_p10 = scmp.ne.s32.totalorder %s252_s8, %s398_s2  ;;  %p404_p12 = scmp.lt.s32.totalorder %s398_s2, %s398_s2 }
  0x3d   :  { %289 = vmatpush3.bf16.msra.mxu0 %v323_v2  ;;  %297 = vmatpush3.bf16.msra.mxu1 %v325_v6  ;;  %p405_p13 = por %p404_p12, %p403_p11 }
  0x3e   :  { %298 = vmatprep.subr.bf16.mxu1 %v431_v0 }
  0x3f   :  { %p406_p0 = pnand %p405_p13, %p399_p10 }
  0x40   :  { %291 = vmatmul.mubr.msk.bf16.vlgmr.msra.gmra.mrb[0].mxu0 %vm86_vm1, %v62_v5 }
  0x41   :  { %299 = vmatpush3.bf16.msra.mxu1 %v326_v7 }
  0x42   :  { %300 = vmatprep.subr.bf16.mxu1 %v431_v0 }
  0x45   :  { %301 = vmatpush3.bf16.msra.mxu1 %v327_v8 }
  0x46   :  { %302 = vmatprep.subr.bf16.mxu1 %v431_v0 }
  0x49   :  { %303 = vmatpush3.bf16.msra.mxu1 %v328_v9 }
  0x4a   :  { %304 = vmatprep.subr.bf16.mxu1 %v431_v0 }
  0x4d   :  { %305 = vmatpush3.bf16.msra.mxu1 %v329_v10 }
  0x4e   :  { %306 = vmatprep.subr.bf16.mxu1 %v431_v0 }
  0x51   :  { %307 = vmatpush3.bf16.msra.mxu1 %v330_v11 }
  0x52   :  { %308 = vmatprep.subr.bf16.mxu1 %v431_v0 }
  0x55   :  { %309 = vmatpush3.bf16.msra.mxu1 %v331_v12 }
 0x113   :  { %v124_v14 = vpop.f32.mrb[0].mxu0 }
 0x114   :  { %v125_v15 = vadd.f32 %v261_v13, %v124_v14  ;;  %v292_v16 = vpop.f32.mrb[1].mxu0 }
 0x115   :  { %v127_v17 = vpop.f32.mrb[2].mxu0 }
 0x116   :  { %v130_v18 = vmax.f32 %v125_v15, 0.0  ;;  %v293_v19 = vpop.f32.mrb[3].mxu0 }
 0x118   :  { %v131_v20 = vpack.c.bf16 %v130_v18, %v130_v18 }
 0x11a   :  { %311 = vmatmul.mubr.bf16.vlgmr.msra.gmra.mrb[0].mxu1 %v131_v20 }
 0x1ed   :  { %v237_v22 = vpop.f32.mrb[0].mxu1 }
 0x1ee   :  { %v238_v23 = vadd.f32 %v265_v21, %v237_v22  ;;  %v312_v24 = vpop.f32.mrb[1].mxu1 }
 0x1ef   :  { %v240_v25 = vpop.f32.mrb[2].mxu1 }
 0x1f0   :  { %v243_v26 = vpack.c.bf16 %v238_v23, %v238_v23  ;;  %v313_v27 = vpop.f32.mrb[3].mxu1 }
 0x1f2   :  { %244 = vst [vmem:[#allocation8] sm:$0xf] %v243_v26 }
 0x1f3   :  { %409 = shalt.err (!%p406_p0)
}
 0x1f4   :  { %s410_s4 = scalar_lea.hbm %s529_s5, 64 }
 0x1f5   :  { %p411_p1 = scmp.ne.s32.totalorder %s529_s5, %s410_s4  ;;  %p414_p2 = scmp.lt.u32.totalorder %s410_s4, %s529_s5 }
 0x1f7   :  { %p416_p3 = pnand %p414_p2, %p411_p1 }
 0x1f9   :  { %419 = shalt.err (!%p416_p3)
}
 0x1fa   :  { %254 = dma.vmem_to_hbm [thread:$0]  %s252_s8, 64, %s529_s5, [#allocation4]  }
 0x1fb   :  { %424 = dma.done.wait [#allocation4], 64  }
 0x1fc   :  { %425 = vsyncadd [#allocation4], 4294967232 }
 0x1fd   :  { %258 = vsyncpa [#allocation3], 1 }
 0x1fe   :  { %259 = vsyncpa [#allocation6], 1 }
 0x1ff   :  { %260 = vsyncpa [#allocation4], 1 }

</bundles_post_ra>
